<compile_context>
chip_gen: v7x
topology: tpu7x:2x2x1
jax: 0.10.0
libtpu: 0.0.40
codegen_flags: <defaults>
</compile_context>

<pallas_src>
import functools
import math

import jax
import jax.numpy as jnp
from jax.experimental import pallas as pl
from jax.experimental.pallas import tpu as pltpu


def _round_up(a, m):
    return ((a + m - 1) // m) * m


def _sab_kernel(x_ref, bigw_ref, sseg_ref, bigl_ref, o_ref,
                *, N, dim_att, decoder, mxu_dtype, eps=1e-5):
    """One batch tile. All arrays are 2-D (batch, flattened-features)."""
    HN = dim_att * N

    # Fused (first o Q | first o K | first o V) projection, one MXU push.
    # Column layout of qkv: j*N + n  (j in [0, 3*dim_att), n in [0, N)).
    # x and big_w are already in mxu_dtype (bf16 by default); accumulate f32.
    qkv = jnp.dot(x_ref[...], bigw_ref[...],
                  preferred_element_type=jnp.float32)

    q = qkv[:, 0:HN]                       # 1/N already folded into these cols
    k = qkv[:, HN:2 * HN]
    v = qkv[:, 2 * HN:3 * HN]

    # s[b, h*N+n] = sum_m K[b,m,h]*V[b,m,h] (broadcast over n) via 0/1 matmul.
    kv = (k * v).astype(mxu_dtype)         # only the MXU input is narrowed
    s = jnp.dot(kv, sseg_ref[...], preferred_element_type=jnp.float32)

    w = q * s + v                          # (Bt, dim_att*N), f32

    if not decoder:
        # ln0 over the flattened N*dim_att axis (stats are permutation
        # invariant, so the h*N+n column order is fine).  Single-pass var.
        mu0 = jnp.mean(w, axis=-1, keepdims=True)
        var0 = jnp.mean(w * w, axis=-1, keepdims=True) - mu0 * mu0
        w = (w - mu0) * jax.lax.rsqrt(var0 + eps)

    # Final Linear; big_l columns are n*dim_out + o (row-major flattened
    # output) -> lane-dense unmasked store, wrapper reshape is free.
    out = jnp.dot(w.astype(mxu_dtype), bigl_ref[...],
                  preferred_element_type=jnp.float32)

    if not decoder:
        mu1 = jnp.mean(out, axis=-1, keepdims=True)
        var1 = jnp.mean(out * out, axis=-1, keepdims=True) - mu1 * mu1
        out = jnp.tanh((out - mu1) * jax.lax.rsqrt(var1 + eps))
    # decoder=True: reference returns Linear(W) directly (no activation / LN).

    o_ref[...] = out.astype(o_ref.dtype)


def sab_forward(x, params, *, N, dim_in, dim_att, dim_out,
                encoder=True, decoder=True, block_b=1024,
                mxu_dtype=jnp.bfloat16, out_dtype=jnp.float32):
    wf, wq, wk, wv, wl = [p.astype(jnp.float32) for p in params]  # (out, in)
    H3 = 3 * dim_att
    HN = dim_att * N
    NO = N * dim_out

    # --- fold 1/N into Q and fold 'first' into the fused QKV weight ---------
    wq_scaled = wq / float(N)                                 # exact algebra
    wqkv_t = jnp.concatenate([wq_scaled.T, wk.T, wv.T], axis=1)  # (dim_in, 3*dim_att)
    if encoder:
        wqkv_t = wf.T @ wqkv_t

    eye_n = jnp.eye(N, dtype=jnp.float32)

    if encoder:
        assert dim_in == 3, "encoder=True implies dim_in == 3"
        assert x.shape[-1] == dim_in * N
        batch_shape = x.shape[:-1]
        xs = x.reshape(-1, dim_in * N).astype(jnp.float32)    # d-major flat
        # rows d*N+n, cols j*N+n'
        big_w = jnp.kron(wqkv_t, eye_n)                       # (dim_in*N, 3*dim_att*N)
        C = dim_in * N
    else:
        assert x.shape[-2:] == (N, dim_in)
        batch_shape = x.shape[:-2]
        xs = x.reshape(-1, N * dim_in).astype(jnp.float32)    # n-major flat
        # rows n*dim_in+d, cols j*N+n'
        big_w = (eye_n[:, None, None, :] * wqkv_t[None, :, :, None]
                 ).reshape(N * dim_in, H3 * N)
        C = N * dim_in

    # Pad the contraction dim to a lane-dense multiple of 128 (clean DMA /
    # unmasked vector loads); matching zero rows in big_w keep it exact.
    C_pad = max(128, _round_up(C, 128))
    if C_pad != C:
        xs = jnp.pad(xs, ((0, 0), (0, C_pad - C)))
        big_w = jnp.pad(big_w, ((0, C_pad - C), (0, 0)))

    # segmented-sum-and-broadcast matrix: [h'*N+m, h*N+n] = delta(h,h')
    sseg = jnp.kron(jnp.eye(dim_att, dtype=jnp.float32),
                    jnp.ones((N, N), dtype=jnp.float32))      # (HN, HN), 0/1

    # final linear, kron-expanded to emit row-major flattened (N*dim_out):
    # [h*N+n', n*dim_out+o] = Wl[o,h] * delta(n',n)
    big_l = (wl.T[:, None, None, :] * eye_n[None, :, :, None]
             ).reshape(HN, NO)

    # Only MXU operands are narrowed; all element-wise math stays f32.
    xs = xs.astype(mxu_dtype)
    big_w = big_w.astype(mxu_dtype)
    sseg = sseg.astype(mxu_dtype)          # 0/1 -> exact in bf16
    big_l = big_l.astype(mxu_dtype)

    # --- batch tiling: sublane-aligned, >=2 blocks when B is large enough ---
    B = xs.shape[0]
    if B < 16:
        Bt = _round_up(max(B, 1), 8)                          # one small tile
    else:
        Bt = min(block_b, _round_up(-(-B // 2), 8))           # >= 2 blocks
    num_blocks = -(-B // Bt)
    Bp = Bt * num_blocks
    if Bp != B:                                               # pad whole tiles
        xs = jnp.pad(xs, ((0, Bp - B), (0, 0)))

    kernel = functools.partial(_sab_kernel, N=N, dim_att=dim_att,
                               decoder=decoder, mxu_dtype=mxu_dtype, eps=1e-5)

    out = pl.pallas_call(
        kernel,
        out_shape=jax.ShapeDtypeStruct((Bp, NO), out_dtype),
        grid=(num_blocks,),
        in_specs=[
            pl.BlockSpec((Bt, C_pad), lambda b: (b, 0)),      # batch-tiled x
            pl.BlockSpec((C_pad, H3 * N), lambda b: (0, 0)),  # grid-invariant
            pl.BlockSpec((HN, HN), lambda b: (0, 0)),
            pl.BlockSpec((HN, NO), lambda b: (0, 0)),
        ],
        out_specs=pl.BlockSpec((Bt, NO), lambda b: (b, 0)),
        compiler_params=pltpu.CompilerParams(
            dimension_semantics=("parallel",)),               # 2x on v7x
    )(xs, big_w, sseg, big_l)

    out = out[:B].astype(jnp.float32)
    return out.reshape(*batch_shape, N, dim_out)


# ---------------------------------------------------------------------------
# Pure-JAX reference (direct transcription of the PyTorch forward), for checks.
# ---------------------------------------------------------------------------
def sab_reference(x, params, *, N, dim_in, dim_att, dim_out,
                  encoder=True, decoder=True, eps=1e-5):
    wf, wq, wk, wv, wl = [p.astype(jnp.float32) for p in params]
    if encoder:
        xs = jnp.stack([x[..., :N], x[..., N:2 * N], x[..., 2 * N:3 * N]], axis=-1)
        xs = xs @ wf.T
    else:
        xs = x
    q = xs @ wq.T
    k = xs @ wk.T
    v = xs @ wv.T
    s = jnp.sum(k * v, axis=-2, keepdims=True)
    w = q * s / N + v
    if decoder:
        return w @ wl.T

    def ln(t):
        flat = t.reshape(*t.shape[:-2], -1)
        mu = flat.mean(-1, keepdims=True)
        var = ((flat - mu) ** 2).mean(-1, keepdims=True)
        return ((flat - mu) * jax.lax.rsqrt(var + eps)).reshape(t.shape)

    w = ln(w)
    out = w @ wl.T
    return jnp.tanh(ln(out))


def init_params(key, N, dim_in, dim_att, dim_out):
    """Deterministic synthetic weights (xavier-uniform style, PyTorch (out,in))."""
    k0, k1, k2, k3, k4 = jax.random.split(key, 5)

    def xavier(k, fan_out, fan_in, gain=1.0):
        bound = gain * math.sqrt(6.0 / (fan_in + fan_out))
        return jax.random.uniform(k, (fan_out, fan_in), jnp.float32, -bound, bound)

    wf = xavier(k0, dim_in, dim_in)                    # self.first
    wq = xavier(k1, dim_att, dim_in)                   # self.Q
    wk = xavier(k2, dim_att, dim_in)                   # self.K
    wv = xavier(k3, dim_att, dim_in)                   # self.V
    wl = xavier(k4, dim_out, dim_att, gain=5.0 / 3.0)  # self.Linear
    return wf, wq, wk, wv, wl


if __name__ == "__main__":
    N, dim_in, dim_att, dim_out = 8, 3, 32, 16
    B = 2

    key = jax.random.PRNGKey(0)
    kx, kx2, kp = jax.random.split(key, 3)
    params = init_params(kp, N, dim_in, dim_att, dim_out)

    # encoder=True expects a flat (..., 3*N) input.
    x = jax.random.normal(kx, (B, 3 * N), jnp.float32)
    kw = dict(N=N, dim_in=dim_in, dim_att=dim_att, dim_out=dim_out, encoder=True)

    # --- default fast path: bf16 MXU inputs, f32 accumulation ---------------
    out_dec = sab_forward(x, params, decoder=True, **kw)
    jax.block_until_ready(out_dec)
    ref_dec = sab_reference(x, params, decoder=True, **kw)
    assert out_dec.shape == (B, N, dim_out)
    assert bool(jnp.allclose(out_dec, ref_dec, rtol=3e-2, atol=3e-2))

    out_enc = sab_forward(x, params, decoder=False, **kw)
    jax.block_until_ready(out_enc)
    ref_enc = sab_reference(x, params, decoder=False, **kw)
    assert out_enc.shape == (B, N, dim_out)
    assert bool(jnp.allclose(out_enc, ref_enc, rtol=3e-2, atol=3e-2))

    # --- exactness path: f32 MXU inputs, tight tolerance --------------------
    out_dec32 = sab_forward(x, params, decoder=True, mxu_dtype=jnp.float32, **kw)
    out_enc32 = sab_forward(x, params, decoder=False, mxu_dtype=jnp.float32, **kw)
    jax.block_until_ready((out_dec32, out_enc32))
    assert bool(jnp.allclose(out_dec32, ref_dec, rtol=2e-4, atol=2e-4))
    assert bool(jnp.allclose(out_enc32, ref_enc, rtol=2e-4, atol=2e-4))

    # --- multi-block / padded-batch path (2 parallel grid blocks) -----------
    B2 = 40
    x2 = jax.random.normal(kx2, (B2, 3 * N), jnp.float32)
    out_big = sab_forward(x2, params, decoder=True, **kw)
    jax.block_until_ready(out_big)
    ref_big = sab_reference(x2, params, decoder=True, **kw)
    assert out_big.shape == (B2, N, dim_out)
    assert bool(jnp.allclose(out_big, ref_big, rtol=3e-2, atol=3e-2))

    assert bool(jnp.all(jnp.isfinite(out_dec))) and bool(jnp.all(jnp.isfinite(out_enc)))

    print("KERNEL_OK")
</pallas_src>

<mosaic_0001>
module attributes {stable_mosaic.version = 11 : i64} {
  func.func @_sab_kernel(%arg0: i32, %arg1: memref<8x128xbf16, #tpu.memory_space<vmem>>, %arg2: memref<128x768xbf16, #tpu.memory_space<vmem>>, %arg3: memref<256x256xbf16, #tpu.memory_space<vmem>>, %arg4: memref<256x128xbf16, #tpu.memory_space<vmem>>, %arg5: memref<8x128xf32, #tpu.memory_space<vmem>>) attributes {dimension_semantics = [#tpu.dimension_semantics<parallel>], iteration_bounds = array<i64: 1>, scalar_prefetch = 0 : i64, scratch_operands = 0 : i64, tpu.core_type = #tpu.core_type<tc>, window_params = [{transform_indices = @transform_0, window_bounds = array<i64: 8, 128>}, {pipeline_mode = #tpu.pipeline_mode<synchronous>, transform_indices = @transform_1, window_bounds = array<i64: 128, 768>}, {pipeline_mode = #tpu.pipeline_mode<synchronous>, transform_indices = @transform_2, window_bounds = array<i64: 256, 256>}, {pipeline_mode = #tpu.pipeline_mode<synchronous>, transform_indices = @transform_3, window_bounds = array<i64: 256, 128>}, {transform_indices = @transform_4, window_bounds = array<i64: 8, 128>}]} {
    %c0 = arith.constant 0 : index
    %c0_0 = arith.constant 0 : index
    %0 = vector.load %arg1[%c0, %c0_0] : memref<8x128xbf16, #tpu.memory_space<vmem>>, vector<8x128xbf16>
    %c0_1 = arith.constant 0 : index
    %c0_2 = arith.constant 0 : index
    %1 = vector.load %arg2[%c0_1, %c0_2] : memref<128x768xbf16, #tpu.memory_space<vmem>>, vector<128x768xbf16>
    %cst = arith.constant dense<0.000000e+00> : vector<8x768xf32>
    %2 = tpu.matmul %0, %1, %cst {dimension_numbers = #tpu.dot_dimension_numbers<[1], [0], [0], [1], [0, 0, 1, 1], [], []>} : vector<8x128xbf16>, vector<128x768xbf16>, vector<8x768xf32> -> vector<8x768xf32>
    %3 = vector.extract_strided_slice %2 {offsets = [0, 0], sizes = [8, 256], strides = [1, 1]} : vector<8x768xf32> to vector<8x256xf32>
    %4 = vector.extract_strided_slice %2 {offsets = [0, 256], sizes = [8, 256], strides = [1, 1]} : vector<8x768xf32> to vector<8x256xf32>
    %5 = vector.extract_strided_slice %2 {offsets = [0, 512], sizes = [8, 256], strides = [1, 1]} : vector<8x768xf32> to vector<8x256xf32>
    %6 = arith.mulf %4, %5 : vector<8x256xf32>
    %7 = arith.truncf %6 : vector<8x256xf32> to vector<8x256xbf16>
    %c0_3 = arith.constant 0 : index
    %c0_4 = arith.constant 0 : index
    %8 = vector.load %arg3[%c0_3, %c0_4] : memref<256x256xbf16, #tpu.memory_space<vmem>>, vector<256x256xbf16>
    %cst_5 = arith.constant dense<0.000000e+00> : vector<8x256xf32>
    %9 = tpu.matmul %7, %8, %cst_5 {dimension_numbers = #tpu.dot_dimension_numbers<[1], [0], [0], [1], [0, 0, 1, 1], [], []>} : vector<8x256xbf16>, vector<256x256xbf16>, vector<8x256xf32> -> vector<8x256xf32>
    %10 = arith.mulf %3, %9 : vector<8x256xf32>
    %11 = arith.addf %10, %5 : vector<8x256xf32>
    %12 = arith.truncf %11 : vector<8x256xf32> to vector<8x256xbf16>
    %c0_6 = arith.constant 0 : index
    %c0_7 = arith.constant 0 : index
    %13 = vector.load %arg4[%c0_6, %c0_7] : memref<256x128xbf16, #tpu.memory_space<vmem>>, vector<256x128xbf16>
    %cst_8 = arith.constant dense<0.000000e+00> : vector<8x128xf32>
    %14 = tpu.matmul %12, %13, %cst_8 {dimension_numbers = #tpu.dot_dimension_numbers<[1], [0], [0], [1], [0, 0, 1, 1], [], []>} : vector<8x256xbf16>, vector<256x128xbf16>, vector<8x128xf32> -> vector<8x128xf32>
    %c0_9 = arith.constant 0 : index
    %c0_10 = arith.constant 0 : index
    %15 = vector.load %arg5[%c0_9, %c0_10] : memref<8x128xf32, #tpu.memory_space<vmem>>, vector<8x128xf32>
    tpu.vector_store %arg5[%c0_9, %c0_10], %14 {strides = array<i32>} : memref<8x128xf32, #tpu.memory_space<vmem>>, vector<8x128xf32>,
    return
  }
  func.func @transform_0(%arg0: i32) -> (i32, i32) {
    %c0_i32 = arith.constant 0 : i32
    %c0_i32_0 = arith.constant 0 : i32
    return %arg0, %c0_i32 : i32, i32
  }
  func.func @transform_1(%arg0: i32) -> (i32, i32) {
    %c0_i32 = arith.constant 0 : i32
    %c0_i32_0 = arith.constant 0 : i32
    %c0_i32_1 = arith.constant 0 : i32
    return %c0_i32, %c0_i32_0 : i32, i32
  }
  func.func @transform_2(%arg0: i32) -> (i32, i32) {
    %c0_i32 = arith.constant 0 : i32
    %c0_i32_0 = arith.constant 0 : i32
    %c0_i32_1 = arith.constant 0 : i32
    return %c0_i32, %c0_i32_0 : i32, i32
  }
  func.func @transform_3(%arg0: i32) -> (i32, i32) {
    %c0_i32 = arith.constant 0 : i32
    %c0_i32_0 = arith.constant 0 : i32
    %c0_i32_1 = arith.constant 0 : i32
    return %c0_i32, %c0_i32_0 : i32, i32
  }
  func.func @transform_4(%arg0: i32) -> (i32, i32) {
    %c0_i32 = arith.constant 0 : i32
    %c0_i32_0 = arith.constant 0 : i32
    return %arg0, %c0_i32 : i32, i32
  }
}

</mosaic_0001>

<bundles_post_ra>
// kernel: tpu_custom_call.1
= control target key start
LH: loop header
LB: loop body
LE: loop exit
PB: predicated region body
PF: predicated region fallthrough
CT: control target
= control target key end

     0   :  { %9 = vsyncpa [#allocation3], 0  ;;  %s1402_s0 = inlined_call_operand.hbm [shape: bf16[8,128], index: 0, kind: input, shape index: {}]   ;;  %s1403_s1 = inlined_call_operand.hbm [shape: bf16[128,768], index: 1, kind: input, shape index: {}]   ;;  %s1404_s2 = inlined_call_operand.hbm [shape: bf16[256,256], index: 2, kind: input, shape index: {}]   ;;  %s1405_s3 = inlined_call_operand.hbm [shape: bf16[256,128], index: 3, kind: input, shape index: {}]   ;;  %s1406_s4 = inlined_call_operand.hbm [shape: f32[8,128], index: 4, kind: output, shape index: {}]  }
   0x1   :  { %10 = vsyncpa [#allocation6], 0 }
   0x2   :  { %11 = vsyncpa [#allocation9], 0 }
   0x3   :  { %12 = vsyncpa [#allocation4], 0  ;;  %s1297_s15 = smov [#allocation5]   ;;  %s1179_s19 = scalar_lea.hbm %s1403_s1, 6144 }
   0x4   :  { %s28_s16 = sshll.u32 %s1297_s15, 4  ;;  %p1180_p0 = scmp.ne.s32.totalorder %s1403_s1, %s1179_s19  ;;  %s29_s16 = int_to_ptr.vmem [resolvable:$true] %s28_s16 }
   0x5   :  { %p1183_p1 = scmp.lt.u32.totalorder %s1179_s19, %s1403_s1 }
   0x7   :  { %p1185_p2 = pnand %p1183_p1, %p1180_p0 }
   0x9   :  { %1188 = shalt.err (!%p1185_p2)
}
   0xa   :  { %s1189_s24 = scalar_lea.vmem %s29_s16, 6144  ;;  %p1194_p4 = scmp.lt.s32.totalorder %s29_s16, %s29_s16 }
   0xb   :  { %p1190_p3 = scmp.ne.s32.totalorder %s29_s16, %s1189_s24  ;;  %p1195_p5 = scmp.lt.s32.totalorder %s1189_s24, %s1189_s24 }
   0xd   :  { %p1196_p6 = por %p1195_p5, %p1194_p4 }
   0xf   :  { %p1197_p7 = pnand %p1196_p6, %p1190_p3 }
  0x11   :  { %1200 = shalt.err (!%p1197_p7)
}
  0x12   :  { %s1298_s25 = smov 384   ;;  %s1299_s26 = smov 24  }
  0x13   :  { %34 = dma.hbm_to_vmem [thread:$0]  %s1403_s1, 6144, %s29_s16, [#allocation6], %s1298_s25, %s1298_s25, %s1299_s26  }
  0x14   :  { %s1300_s29 = smov [#allocation2]   ;;  %s1301_s5 = smov [#allocation7]  }
  0x15   :  { %s19_s30 = sshll.u32 %s1300_s29, 4  ;;  %s40_s6 = sshll.u32 %s1301_s5, 4  ;;  %s20_s30 = int_to_ptr.vmem [resolvable:$true] %s19_s30  ;;  %s41_s6 = int_to_ptr.vmem [resolvable:$true] %s40_s6 }
  0x16   :  { %s1201_s9 = scalar_lea.hbm %s1402_s0, 64 }
  0x17   :  { %p1202_p8 = scmp.ne.s32.totalorder %s1402_s0, %s1201_s9  ;;  %p1205_p9 = scmp.lt.u32.totalorder %s1201_s9, %s1402_s0 }
  0x19   :  { %p1207_p10 = pnand %p1205_p9, %p1202_p8 }
  0x1b   :  { %1210 = shalt.err (!%p1207_p10)
}
  0x1c   :  { %s1211_s1 = scalar_lea.vmem %s20_s30, 64  ;;  %p1216_p12 = scmp.lt.s32.totalorder %s20_s30, %s20_s30 }
  0x1d   :  { %p1212_p11 = scmp.ne.s32.totalorder %s20_s30, %s1211_s1  ;;  %p1217_p13 = scmp.lt.s32.totalorder %s1211_s1, %s1211_s1 }
  0x1f   :  { %p1218_p0 = por %p1217_p13, %p1216_p12 }
  0x21   :  { %p1219_p1 = pnand %p1218_p0, %p1212_p11 }
  0x23   :  { %1222 = shalt.err (!%p1219_p1)
}
  0x24   :  { %22 = dma.hbm_to_vmem [thread:$0]  %s1402_s0, 64, %s20_s30, [#allocation3]  }
  0x25   :  { %s1223_s18 = scalar_lea.hbm %s1404_s2, 4096 }
  0x26   :  { %p1224_p2 = scmp.ne.s32.totalorder %s1404_s2, %s1223_s18  ;;  %p1227_p3 = scmp.lt.u32.totalorder %s1223_s18, %s1404_s2 }
  0x28   :  { %p1229_p4 = pnand %p1227_p3, %p1224_p2 }
  0x2a   :  { %1232 = shalt.err (!%p1229_p4)
}
  0x2b   :  { %s1233_s23 = scalar_lea.vmem %s41_s6, 4096  ;;  %p1238_p6 = scmp.lt.s32.totalorder %s41_s6, %s41_s6 }
  0x2c   :  { %p1234_p5 = scmp.ne.s32.totalorder %s41_s6, %s1233_s23  ;;  %p1239_p7 = scmp.lt.s32.totalorder %s1233_s23, %s1233_s23 }
  0x2e   :  { %p1240_p8 = por %p1239_p7, %p1238_p6 }
  0x30   :  { %p1241_p9 = pnand %p1240_p8, %p1234_p5 }
  0x32   :  { %1244 = shalt.err (!%p1241_p9)
}
  0x33   :  { %s1302_s0 = smov 128   ;;  %s1303_s24 = smov 8  }
  0x34   :  { %46 = dma.hbm_to_vmem [thread:$0]  %s1404_s2, 4096, %s41_s6, [#allocation6], %s1302_s0, %s1302_s0, %s1303_s24  }
  0x35   :  { %s1304_s27 = smov [#allocation8]   ;;  %s1245_s5 = scalar_lea.hbm %s1405_s3, 2048 }
  0x36   :  { %s52_s28 = sshll.u32 %s1304_s27, 4  ;;  %p1246_p10 = scmp.ne.s32.totalorder %s1405_s3, %s1245_s5  ;;  %s53_s28 = int_to_ptr.vmem [resolvable:$true] %s52_s28 }
  0x37   :  { %p1249_p11 = scmp.lt.u32.totalorder %s1245_s5, %s1405_s3 }
  0x39   :  { %p1251_p12 = pnand %p1249_p11, %p1246_p10 }
  0x3b   :  { %1254 = shalt.err (!%p1251_p12)
}
  0x3c   :  { %s1255_s11 = scalar_lea.vmem %s53_s28, 2048  ;;  %p1260_p0 = scmp.lt.s32.totalorder %s53_s28, %s53_s28 }
  0x3d   :  { %p1256_p13 = scmp.ne.s32.totalorder %s53_s28, %s1255_s11  ;;  %p1261_p1 = scmp.lt.s32.totalorder %s1255_s11, %s1255_s11 }
  0x3f   :  { %p1262_p2 = por %p1261_p1, %p1260_p0 }
  0x41   :  { %p1263_p3 = pnand %p1262_p2, %p1256_p13 }
  0x43   :  { %1266 = shalt.err (!%p1263_p3)
}
  0x44   :  { %s1305_s2 = smov 64   ;;  %s1306_s6 = smov 4  }
  0x45   :  { %58 = dma.hbm_to_vmem [thread:$0]  %s1405_s3, 2048, %s53_s28, [#allocation9], %s1305_s2, %s1305_s2, %s1306_s6  }
  0x46   :  { %1289 = dma.done.wait [#allocation3], 64  }
  0x47   :  { %1290 = vsyncadd [#allocation3], 4294967232 }
  0x48   :  { %1291 = dma.done.wait [#allocation6], 10240  }
  0x49   :  { %1292 = vsyncadd [#allocation6], 4294957056 }
  0x4a   :  { %1293 = dma.done.wait [#allocation9], 2048  }
  0x4b   :  { %1294 = vsyncadd [#allocation9], 4294965248  ;;  %v1307_v0 = vmov 0   ;;  %v1043_v1 = vld [vmem:[#allocation5 + $0x4] ss:$24 sps:$4 sm:$0xff]   ;;  %s1308_s3 = smov [#allocation10]  }
  0x4c   :  { %393 = vmatprep.mubr.bf16.mxu0 %v1307_v0  ;;  %434 = vmatprep.mubr.bf16.mxu1 %v1307_v0  ;;  %v1045_v2 = vld [vmem:[#allocation5] ss:$24 sps:$4 sm:$0xff]   ;;  %v1046_v3 = vld [vmem:[#allocation5 + $0x34] ss:$24 sps:$4 sm:$0xff]   ;;  %v1048_v4 = vld [vmem:[#allocation5 + $0x30] ss:$24 sps:$4 sm:$0xff]  }
  0x4d   :  { %361 = vmatprep.subr.bf16.mxu0 %v1043_v1  ;;  %v1049_v5 = vld [vmem:[#allocation5 + $0x64] ss:$24 sps:$4 sm:$0xff]   ;;  %v1051_v6 = vld [vmem:[#allocation5 + $0x60] ss:$24 sps:$4 sm:$0xff]   ;;  %v1052_v7 = vld [vmem:[#allocation5 + $0x94] ss:$24 sps:$4 sm:$0xff]  }
  0x4e   :  { %362 = vmatpush1.bf16.msra.mxu0 %v1045_v2  ;;  %v1054_v8 = vld [vmem:[#allocation5 + $0x90] ss:$24 sps:$4 sm:$0xff]   ;;  %v1067_v9 = vld [vmem:[#allocation5 + $0xc] ss:$24 sps:$4 sm:$0xff]   ;;  %v1073_v12 = vld [vmem:[#allocation5 + $0x3c] ss:$24 sps:$4 sm:$0xff]  }
  0x4f   :  { %363 = vmatprep.subr.bf16.mxu0 %v1046_v3  ;;  %v1069_v10 = vld [vmem:[#allocation5 + $0x8] ss:$24 sps:$4 sm:$0xff]   ;;  %v1055_v11 = vld [vmem:[#allocation5 + $0xc4] ss:$24 sps:$4 sm:$0xff]   ;;  %402 = vmatprep.subr.bf16.mxu1 %v1067_v9  ;;  %v1075_v13 = vld [vmem:[#allocation5 + $0x38] ss:$24 sps:$4 sm:$0xff]  }
  0x50   :  { %403 = vmatpush1.bf16.msra.mxu1 %v1069_v10  ;;  %v1057_v14 = vld [vmem:[#allocation5 + $0xc0] ss:$24 sps:$4 sm:$0xff]   ;;  %v1058_v15 = vld [vmem:[#allocation5 + $0xf4] ss:$24 sps:$4 sm:$0xff]   ;;  %v1060_v17 = vld [vmem:[#allocation5 + $0xf0] ss:$24 sps:$4 sm:$0xff]  }
  0x51   :  { %404 = vmatprep.subr.bf16.mxu1 %v1073_v12  ;;  %v1079_v16 = vld [vmem:[#allocation5 + $0x6c] ss:$24 sps:$4 sm:$0xff]   ;;  %v1081_v18 = vld [vmem:[#allocation5 + $0x68] ss:$24 sps:$4 sm:$0xff]   ;;  %v1085_v19 = vld [vmem:[#allocation5 + $0x9c] ss:$24 sps:$4 sm:$0xff]  }
  0x52   :  { %364 = vmatpush1.bf16.msra.mxu0 %v1048_v4  ;;  %v1061_v20 = vld [vmem:[#allocation5 + $0x124] ss:$24 sps:$4 sm:$0xff]   ;;  %v1063_v21 = vld [vmem:[#allocation5 + $0x120] ss:$24 sps:$4 sm:$0xff]   ;;  %v1064_v24 = vld [vmem:[#allocation5 + $0x154] ss:$24 sps:$4 sm:$0xff]  }
  0x53   :  { %365 = vmatprep.subr.bf16.mxu0 %v1049_v5  ;;  %v1087_v22 = vld [vmem:[#allocation5 + $0x98] ss:$24 sps:$4 sm:$0xff]   ;;  %v1091_v23 = vld [vmem:[#allocation5 + $0xcc] ss:$24 sps:$4 sm:$0xff]   ;;  %v1093_v26 = vld [vmem:[#allocation5 + $0xc8] ss:$24 sps:$4 sm:$0xff]  }
  0x54   :  { %405 = vmatpush1.bf16.msra.mxu1 %v1075_v13  ;;  %v1066_v25 = vld [vmem:[#allocation5 + $0x150] ss:$24 sps:$4 sm:$0xff]   ;;  %v1097_v27 = vld [vmem:[#allocation5 + $0xfc] ss:$24 sps:$4 sm:$0xff]   ;;  %v1103_v32 = vld [vmem:[#allocation5 + $0x12c] ss:$24 sps:$4 sm:$0xff]  }
  0x55   :  { %406 = vmatprep.subr.bf16.mxu1 %v1079_v16  ;;  %v1072_v28 = vld [vmem:[#allocation5 + $0x14] ss:$24 sps:$4 sm:$0xff]   ;;  %v1384_v29 = vld [vmem:[#allocation2] sm:$0xf]  ;;  %v1070_v30 = vld [vmem:[#allocation5 + $0x10] ss:$24 sps:$4 sm:$0xff]  }
  0x56   :  { %366 = vmatpush1.bf16.msra.mxu0 %v1051_v6  ;;  %v1099_v31 = vld [vmem:[#allocation5 + $0xf8] ss:$24 sps:$4 sm:$0xff]   ;;  %v1078_v33 = vld [vmem:[#allocation5 + $0x44] ss:$24 sps:$4 sm:$0xff]   ;;  %v1105_v35 = vld [vmem:[#allocation5 + $0x128] ss:$24 sps:$4 sm:$0xff]  }
  0x57   :  { %367 = vmatprep.subr.bf16.mxu0 %v1052_v7  ;;  %v1076_v34 = vld [vmem:[#allocation5 + $0x40] ss:$24 sps:$4 sm:$0xff]   ;;  %v1109_v36 = vld [vmem:[#allocation5 + $0x15c] ss:$24 sps:$4 sm:$0xff]   ;;  %v1082_v38 = vld [vmem:[#allocation5 + $0x70] ss:$24 sps:$4 sm:$0xff]  }
  0x58   :  { %407 = vmatpush1.bf16.msra.mxu1 %v1081_v18  ;;  %v1084_v37 = vld [vmem:[#allocation5 + $0x74] ss:$24 sps:$4 sm:$0xff]   ;;  %v1111_v39 = vld [vmem:[#allocation5 + $0x158] ss:$24 sps:$4 sm:$0xff]   ;;  %v1090_v41 = vld [vmem:[#allocation5 + $0xa4] ss:$24 sps:$4 sm:$0xff]  }
  0x59   :  { %408 = vmatprep.subr.bf16.mxu1 %v1085_v19  ;;  %v1117_v40 = vld [vmem:[#allocation7 + $0x4] ss:$8 sps:$4 sm:$0xff]   ;;  %v1088_v42 = vld [vmem:[#allocation5 + $0xa0] ss:$24 sps:$4 sm:$0xff]   ;;  %v1120_v44 = vld [vmem:[#allocation7 + $0x14] ss:$8 sps:$4 sm:$0xff]  }
  0x5a   :  { %368 = vmatpush1.bf16.msra.mxu0 %v1054_v8  ;;  %v1115_v43 = vld [vmem:[#allocation7] ss:$8 sps:$4 sm:$0xff]   ;;  %v1096_v45 = vld [vmem:[#allocation5 + $0xd4] ss:$24 sps:$4 sm:$0xff]   ;;  %v1118_v46 = vld [vmem:[#allocation7 + $0x10] ss:$8 sps:$4 sm:$0xff]  }
  0x5b   :  { %369 = vmatprep.subr.bf16.mxu0 %v1055_v11  ;;  %v1094_v47 = vld [vmem:[#allocation5 + $0xd0] ss:$24 sps:$4 sm:$0xff]   ;;  %v1123_v48 = vld [vmem:[#allocation7 + $0x24] ss:$8 sps:$4 sm:$0xff]   ;;  %v1100_v51 = vld [vmem:[#allocation5 + $0x100] ss:$24 sps:$4 sm:$0xff]  }
  0x5c   :  { %409 = vmatpush1.bf16.msra.mxu1 %v1087_v22  ;;  %v1102_v49 = vld [vmem:[#allocation5 + $0x104] ss:$24 sps:$4 sm:$0xff]   ;;  %v1121_v50 = vld [vmem:[#allocation7 + $0x20] ss:$8 sps:$4 sm:$0xff]   ;;  %v1108_v53 = vld [vmem:[#allocation5 + $0x134] ss:$24 sps:$4 sm:$0xff]  }
  0x5d   :  { %410 = vmatprep.subr.bf16.mxu1 %v1091_v23  ;;  %v1126_v52 = vld [vmem:[#allocation7 + $0x34] ss:$8 sps:$4 sm:$0xff]   ;;  %v1124_v54 = vld [vmem:[#allocation7 + $0x30] ss:$8 sps:$4 sm:$0xff]   ;;  %v1129_v56 = vld [vmem:[#allocation7 + $0x44] ss:$8 sps:$4 sm:$0xff]  }
  0x5e   :  { %370 = vmatpush1.bf16.msra.mxu0 %v1057_v14  ;;  %v1106_v55 = vld [vmem:[#allocation5 + $0x130] ss:$24 sps:$4 sm:$0xff]   ;;  %v1114_v57 = vld [vmem:[#allocation5 + $0x164] ss:$24 sps:$4 sm:$0xff]   ;;  %v1112_v59 = vld [vmem:[#allocation5 + $0x160] ss:$24 sps:$4 sm:$0xff]  }
  0x5f   :  { %371 = vmatprep.subr.bf16.mxu0 %v1058_v15  ;;  %v1127_v58 = vld [vmem:[#allocation7 + $0x40] ss:$8 sps:$4 sm:$0xff]   ;;  %v1132_v60 = vld [vmem:[#allocation7 + $0x54] ss:$8 sps:$4 sm:$0xff]   ;;  %v1130_v61 = vld [vmem:[#allocation7 + $0x50] ss:$8 sps:$4 sm:$0xff]  }
  0x60   :  { %411 = vmatpush1.bf16.msra.mxu1 %v1093_v26  ;;  %v1135_v62 = vld [vmem:[#allocation7 + $0x64] ss:$8 sps:$4 sm:$0xff]   ;;  %v1133_v63 = vld [vmem:[#allocation7 + $0x60] ss:$8 sps:$4 sm:$0xff]   ;;  %v1136_v1 = vld [vmem:[#allocation7 + $0x70] ss:$8 sps:$4 sm:$0xff]  }
  0x61   :  { %412 = vmatprep.subr.bf16.mxu1 %v1097_v27  ;;  %v1141_v2 = vld [vmem:[#allocation7 + $0x84] ss:$8 sps:$4 sm:$0xff]   ;;  %v1139_v3 = vld [vmem:[#allocation7 + $0x80] ss:$8 sps:$4 sm:$0xff]   ;;  %v1144_v4 = vld [vmem:[#allocation7 + $0x94] ss:$8 sps:$4 sm:$0xff]  }
  0x62   :  { %372 = vmatpush1.bf16.msra.mxu0 %v1060_v17  ;;  %v1142_v5 = vld [vmem:[#allocation7 + $0x90] ss:$8 sps:$4 sm:$0xff]   ;;  %v1147_v6 = vld [vmem:[#allocation7 + $0xa4] ss:$8 sps:$4 sm:$0xff]   ;;  %v1145_v7 = vld [vmem:[#allocation7 + $0xa0] ss:$8 sps:$4 sm:$0xff]  }
  0x63   :  { %373 = vmatprep.subr.bf16.mxu0 %v1061_v20  ;;  %v1150_v8 = vld [vmem:[#allocation7 + $0xb4] ss:$8 sps:$4 sm:$0xff]   ;;  %v1148_v9 = vld [vmem:[#allocation7 + $0xb0] ss:$8 sps:$4 sm:$0xff]   ;;  %v1153_v10 = vld [vmem:[#allocation7 + $0xc4] ss:$8 sps:$4 sm:$0xff]  }
  0x64   :  { %413 = vmatpush1.bf16.msra.mxu1 %v1099_v31  ;;  %v1151_v11 = vld [vmem:[#allocation7 + $0xc0] ss:$8 sps:$4 sm:$0xff]   ;;  %v1156_v12 = vld [vmem:[#allocation7 + $0xd4] ss:$8 sps:$4 sm:$0xff]   ;;  %v1154_v13 = vld [vmem:[#allocation7 + $0xd0] ss:$8 sps:$4 sm:$0xff]  }
  0x65   :  { %414 = vmatprep.subr.bf16.mxu1 %v1103_v32  ;;  %v1159_v14 = vld [vmem:[#allocation7 + $0xe4] ss:$8 sps:$4 sm:$0xff]   ;;  %v1157_v15 = vld [vmem:[#allocation7 + $0xe0] ss:$8 sps:$4 sm:$0xff]   ;;  %v1162_v16 = vld [vmem:[#allocation7 + $0xf4] ss:$8 sps:$4 sm:$0xff]  }
  0x66   :  { %374 = vmatpush1.bf16.msra.mxu0 %v1063_v21  ;;  %v1160_v17 = vld [vmem:[#allocation7 + $0xf0] ss:$8 sps:$4 sm:$0xff]   ;;  %v1163_v18 = vld [vmem:[#allocation8 + $0x40] sm:$0xff]   ;;  %v1165_v20 = vld [vmem:[#allocation8 + $0x48] sm:$0xff]   ;;  %s902_s1 = sshll.u32 %s1308_s3, 4  ;;  %s903_s1 = int_to_ptr.vmem [resolvable:$true] %s902_s1 }
  0x67   :  { %375 = vmatprep.subr.bf16.mxu0 %v1064_v24  ;;  %v1164_v19 = vld [vmem:[#allocation8] sm:$0xff]   ;;  %v1166_v21 = vld [vmem:[#allocation8 + $0x8] sm:$0xff]   ;;  %v1167_v22 = vld [vmem:[#allocation8 + $0x50] sm:$0xff]   ;;  %s1267_s14 = scalar_lea.vmem %s903_s1, 128  ;;  %p1272_p5 = scmp.lt.s32.totalorder %s903_s1, %s903_s1 }
  0x68   :  { %415 = vmatpush1.bf16.msra.mxu1 %v1105_v35  ;;  %v1168_v23 = vld [vmem:[#allocation8 + $0x10] sm:$0xff]   ;;  %v1169_v24 = vld [vmem:[#allocation8 + $0x58] sm:$0xff]   ;;  %v1171_v26 = vld [vmem:[#allocation8 + $0x60] sm:$0xff]   ;;  %p1268_p4 = scmp.ne.s32.totalorder %s903_s1, %s1267_s14  ;;  %p1273_p6 = scmp.lt.s32.totalorder %s1267_s14, %s1267_s14 }
  0x69   :  { %416 = vmatprep.subr.bf16.mxu1 %v1109_v36  ;;  %v1172_v27 = vld [vmem:[#allocation8 + $0x20] sm:$0xff]  }
  0x6a   :  { %376 = vmatpush1.bf16.msra.mxu0 %v1066_v25  ;;  %v1170_v25 = vld [vmem:[#allocation8 + $0x18] sm:$0xff]   ;;  %p1274_p7 = por %p1273_p6, %p1272_p5 }
  0x6b   :  { %443 = vmatprep.subr.bf16.mxu0 %v1072_v28  ;;  %v1173_v28 = vld [vmem:[#allocation8 + $0x68] sm:$0xff]  }
  0x6c   :  { %417 = vmatpush1.bf16.msra.mxu1 %v1111_v39  ;;  %p1275_p8 = pnand %p1274_p7, %p1268_p4 }
  0x6d   :  { %394 = vmatmul.mubr.bf16.vlgmr.msra.gmra.mrb[0].mxu0 %v1384_v29  ;;  %680 = vmatprep.subr.bf16.mxu1 %v1117_v40 }
  0x6e   :  { %444 = vmatpush1.bf16.msra.mxu0 %v1070_v30  ;;  %475 = vmatprep.mubr.bf16.mxu0 %v1307_v0  ;;  %v1138_v0 = vld [vmem:[#allocation7 + $0x74] ss:$8 sps:$4 sm:$0xff]  }
  0x6f   :  { %445 = vmatprep.subr.bf16.mxu0 %v1078_v33  ;;  %435 = vmatmul.mubr.bf16.vlgmr.msra.gmra.mrb[0].mxu1 %v1384_v29 }
  0x70   :  { %681 = vmatpush1.bf16.msra.mxu1 %v1115_v43 }
  0x71   :  { %682 = vmatprep.subr.bf16.mxu1 %v1120_v44 }
  0x72   :  { %446 = vmatpush1.bf16.msra.mxu0 %v1076_v34 }
  0x73   :  { %447 = vmatprep.subr.bf16.mxu0 %v1084_v37 }
  0x74   :  { %683 = vmatpush1.bf16.msra.mxu1 %v1118_v46  ;;  %v1175_v46 = vld [vmem:[#allocation8 + $0x70] sm:$0xff]  }
  0x75   :  { %684 = vmatprep.subr.bf16.mxu1 %v1123_v48  ;;  %v1177_v48 = vld [vmem:[#allocation8 + $0x78] sm:$0xff]  }
  0x76   :  { %448 = vmatpush1.bf16.msra.mxu0 %v1082_v38 }
  0x77   :  { %449 = vmatprep.subr.bf16.mxu0 %v1090_v41 }
  0x78   :  { %685 = vmatpush1.bf16.msra.mxu1 %v1121_v50 }
  0x79   :  { %686 = vmatprep.subr.bf16.mxu1 %v1126_v52 }
  0x7a   :  { %450 = vmatpush1.bf16.msra.mxu0 %v1088_v42 }
  0x7b   :  { %451 = vmatprep.subr.bf16.mxu0 %v1096_v45 }
  0x7c   :  { %687 = vmatpush1.bf16.msra.mxu1 %v1124_v54 }
  0x7d   :  { %688 = vmatprep.subr.bf16.mxu1 %v1129_v56 }
  0x7e   :  { %452 = vmatpush1.bf16.msra.mxu0 %v1094_v47  ;;  %v1176_v47 = vld [vmem:[#allocation8 + $0x30] sm:$0xff]  }
  0x7f   :  { %453 = vmatprep.subr.bf16.mxu0 %v1102_v49  ;;  %v1178_v49 = vld [vmem:[#allocation8 + $0x38] sm:$0xff]  }
  0x80   :  { %689 = vmatpush1.bf16.msra.mxu1 %v1127_v58 }
  0x81   :  { %690 = vmatprep.subr.bf16.mxu1 %v1132_v60 }
  0x82   :  { %454 = vmatpush1.bf16.msra.mxu0 %v1100_v51 }
  0x83   :  { %455 = vmatprep.subr.bf16.mxu0 %v1108_v53 }
  0x84   :  { %691 = vmatpush1.bf16.msra.mxu1 %v1130_v61 }
  0x85   :  { %692 = vmatprep.subr.bf16.mxu1 %v1135_v62 }
  0x86   :  { %456 = vmatpush1.bf16.msra.mxu0 %v1106_v55 }
  0x87   :  { %457 = vmatprep.subr.bf16.mxu0 %v1114_v57 }
  0x88   :  { %693 = vmatpush1.bf16.msra.mxu1 %v1133_v63 }
  0x89   :  { %694 = vmatprep.subr.bf16.mxu1 %v1138_v0 }
  0x8a   :  { %458 = vmatpush1.bf16.msra.mxu0 %v1112_v59 }
  0x8b   :  { %1009 = vmatprep.subr.bf16.mxu0 %v1163_v18 }
  0x8c   :  { %695 = vmatpush1.bf16.msra.mxu1 %v1136_v1 }
  0x8d   :  { %476 = vmatmul.mubr.bf16.vlgmr.msra.gmra.mrb[4].mxu0 %v1384_v29  ;;  %696 = vmatprep.subr.bf16.mxu1 %v1141_v2  ;;  %v1174_v29 = vld [vmem:[#allocation8 + $0x28] sm:$0xff]  }
  0x8e   :  { %1010 = vmatpush3.bf16.msra.mxu0 %v1164_v19 }
  0x8f   :  { %1011 = vmatprep.subr.bf16.mxu0 %v1165_v20 }
  0x90   :  { %697 = vmatpush1.bf16.msra.mxu1 %v1139_v3 }
  0x91   :  { %698 = vmatprep.subr.bf16.mxu1 %v1144_v4 }
  0x92   :  { %1012 = vmatpush3.bf16.msra.mxu0 %v1166_v21 }
  0x93   :  { %1013 = vmatprep.subr.bf16.mxu0 %v1167_v22 }
  0x94   :  { %699 = vmatpush1.bf16.msra.mxu1 %v1142_v5 }
  0x95   :  { %700 = vmatprep.subr.bf16.mxu1 %v1147_v6 }
  0x96   :  { %1014 = vmatpush3.bf16.msra.mxu0 %v1168_v23 }
  0x97   :  { %1015 = vmatprep.subr.bf16.mxu0 %v1169_v24 }
  0x98   :  { %701 = vmatpush1.bf16.msra.mxu1 %v1145_v7 }
  0x99   :  { %702 = vmatprep.subr.bf16.mxu1 %v1150_v8 }
  0x9a   :  { %1016 = vmatpush3.bf16.msra.mxu0 %v1170_v25 }
  0x9b   :  { %1017 = vmatprep.subr.bf16.mxu0 %v1171_v26 }
  0x9c   :  { %703 = vmatpush1.bf16.msra.mxu1 %v1148_v9 }
  0x9d   :  { %704 = vmatprep.subr.bf16.mxu1 %v1153_v10 }
  0x9e   :  { %1018 = vmatpush3.bf16.msra.mxu0 %v1172_v27 }
  0x9f   :  { %1019 = vmatprep.subr.bf16.mxu0 %v1173_v28 }
  0xa0   :  { %705 = vmatpush1.bf16.msra.mxu1 %v1151_v11 }
  0xa1   :  { %706 = vmatprep.subr.bf16.mxu1 %v1156_v12 }
  0xa2   :  { %1020 = vmatpush3.bf16.msra.mxu0 %v1174_v29 }
  0xa3   :  { %1021 = vmatprep.subr.bf16.mxu0 %v1175_v46 }
  0xa4   :  { %707 = vmatpush1.bf16.msra.mxu1 %v1154_v13 }
  0xa5   :  { %708 = vmatprep.subr.bf16.mxu1 %v1159_v14 }
  0xa6   :  { %1022 = vmatpush3.bf16.msra.mxu0 %v1176_v47 }
  0xa7   :  { %1023 = vmatprep.subr.bf16.mxu0 %v1177_v48 }
  0xa8   :  { %709 = vmatpush1.bf16.msra.mxu1 %v1157_v15 }
  0xa9   :  { %710 = vmatprep.subr.bf16.mxu1 %v1162_v16 }
  0xaa   :  { %1024 = vmatpush3.bf16.msra.mxu0 %v1178_v49 }
  0xac   :  { %711 = vmatpush1.bf16.msra.mxu1 %v1160_v17 }
 0x140   :  { %v395_v30 = vpop.f32.mrb[0].mxu0 }
 0x141   :  { %v397_v31 = vpop.f32.mrb[1].mxu0 }
 0x142   :  { %v399_v32 = vpop.f32.mrb[2].mxu0  ;;  %v436_v34 = vpop.f32.mrb[0].mxu1 }
 0x143   :  { %v400_v33 = vpop.f32.mrb[3].mxu0  ;;  %v438_v35 = vpop.f32.mrb[1].mxu1 }
 0x144   :  { %v440_v36 = vpop.f32.mrb[2].mxu1 }
 0x145   :  { %v441_v37 = vpop.f32.mrb[3].mxu1 }
 0x160   :  { %v477_v38 = vpop.f32.mrb[4].mxu0 }
 0x161   :  { %v484_v39 = vmul.f32 %v477_v38, %v436_v34  ;;  %v479_v40 = vpop.f32.mrb[5].mxu0 }
 0x162   :  { %v485_v41 = vmul.f32 %v479_v40, %v438_v35  ;;  %v481_v42 = vpop.f32.mrb[6].mxu0 }
 0x163   :  { %v482_v43 = vpop.f32.mrb[7].mxu0  ;;  %v486_v45 = vpack.c.bf16 %v484_v39, %v484_v39 }
 0x164   :  { %v487_v44 = vpack.c.bf16 %v485_v41, %v485_v41 }
 0x166   :  { %712 = vmatprep.mubr.bf16.mxu1 %v487_v44 }
 0x167   :  { %713 = vmatmul.mubr.bf16.vlgmr.msra.gmra.mrb[4].mxu1 %v486_v45 }
 0x23a   :  { %v714_v50 = vpop.f32.mrb[4].mxu1 }
 0x23b   :  { %v721_v51 = vmul.f32 %v714_v50, %v395_v30  ;;  %v716_v52 = vpop.f32.mrb[5].mxu1 }
 0x23c   :  { %v722_v53 = vmul.f32 %v716_v52, %v397_v31  ;;  %v718_v54 = vpop.f32.mrb[6].mxu1 }
 0x23d   :  { %v723_v55 = vadd.f32 %v721_v51, %v477_v38  ;;  %v719_v56 = vpop.f32.mrb[7].mxu1 }
 0x23e   :  { %v724_v57 = vadd.f32 %v722_v53, %v479_v40 }
 0x23f   :  { %v725_v59 = vpack.c.bf16 %v723_v55, %v723_v55 }
 0x240   :  { %v726_v58 = vpack.c.bf16 %v724_v57, %v724_v57 }
 0x242   :  { %887 = vmatprep.mubr.bf16.mxu0 %v726_v58 }
 0x243   :  { %888 = vmatmul.mubr.bf16.vlgmr.msra.gmra.mrb[8].mxu0 %v725_v59 }
 0x316   :  { %v1025_v60 = vpop.f32.mrb[8].mxu0 }
 0x317   :  { %v1026_v61 = vpop.f32.mrb[9].mxu0 }
 0x318   :  { %v1027_v62 = vadd.f32 %v1026_v61, %v1025_v60  ;;  %v1028_v63 = vpop.f32.mrb[10].mxu0 }
 0x319   :  { %v1029_v0 = vpop.f32.mrb[11].mxu0 }
 0x31a   :  { %895 = vst [vmem:[#allocation10] sm:$0xff] %v1027_v62 }
 0x31b   :  { %1278 = shalt.err (!%p1275_p8)
}
 0x31c   :  { %s1279_s17 = scalar_lea.hbm %s1406_s4, 128 }
 0x31d   :  { %p1280_p9 = scmp.ne.s32.totalorder %s1406_s4, %s1279_s17  ;;  %p1283_p10 = scmp.lt.u32.totalorder %s1279_s17, %s1406_s4 }
 0x31f   :  { %p1285_p11 = pnand %p1283_p10, %p1280_p9 }
 0x321   :  { %1288 = shalt.err (!%p1285_p11)
}
 0x322   :  { %905 = dma.vmem_to_hbm [thread:$0]  %s903_s1, 128, %s1406_s4, [#allocation4]  }
 0x323   :  { %1295 = dma.done.wait [#allocation4], 128  }
 0x324   :  { %1296 = vsyncadd [#allocation4], 4294967168 }
 0x325   :  { %909 = vsyncpa [#allocation3], 1 }
 0x326   :  { %910 = vsyncpa [#allocation6], 1 }
 0x327   :  { %911 = vsyncpa [#allocation9], 1 }
 0x328   :  { %912 = vsyncpa [#allocation4], 1 }

</bundles_post_ra>
